<compile_context>
chip_gen: v5e
topology: v5e:2x2
jax: 0.10.0
libtpu: 0.0.40
codegen_flags: <defaults>
</compile_context>

<pallas_src>
import functools

import jax
import jax.numpy as jnp
from jax import lax
from jax.experimental import pallas as pl
from jax.experimental.pallas import tpu as pltpu


def _round_up(x: int, m: int) -> int:
    return ((x + m - 1) // m) * m


def _linear_kernel_single_k(x_ref, w_ref, b_ref, o_ref):
    # x_ref: (tm, K)  w_ref: (tn, K)  b_ref: (1, tn)  o_ref: (tm, tn)
    # Whole K reduction in one MXU pass; write result + bias directly.
    acc = lax.dot_general(
        x_ref[...],
        w_ref[...],
        dimension_numbers=(((1,), (1,)), ((), ())),
        preferred_element_type=jnp.float32,
    )
    o_ref[...] = (acc + b_ref[...]).astype(o_ref.dtype)


def _linear_kernel_multi_k(x_ref, w_ref, b_ref, o_ref, acc_ref):
    # x_ref: (tm, tk)  w_ref: (tn, tk)  b_ref: (1, tn)  o_ref: (tm, tn)
    k = pl.program_id(2)

    @pl.when(k == 0)
    def _init():
        acc_ref[...] = jnp.zeros_like(acc_ref)

    # Contract over K (axis 1 of both operands): y_tile += x_tile @ w_tile^T.
    # The MXU handles the transposed RHS natively; no wrapper transpose needed.
    acc_ref[...] += lax.dot_general(
        x_ref[...],
        w_ref[...],
        dimension_numbers=(((1,), (1,)), ((), ())),
        preferred_element_type=jnp.float32,
    )

    @pl.when(k == pl.num_programs(2) - 1)
    def _finalize():
        o_ref[...] = (acc_ref[...] + b_ref[...]).astype(o_ref.dtype)


@functools.partial(jax.jit, static_argnames=("tm", "tn", "tk"))
def linear_forward(x, weight, bias, *, tm=256, tn=256, tk=512):
    """y = x @ weight.T + bias  (matches torch.nn.Linear forward).

    x:      (M, K) float32
    weight: (N, K) float32  (PyTorch layout: (out_features, in_features))
    bias:   (N,)   float32
    """
    M, K = x.shape
    N, K2 = weight.shape
    assert K == K2, "weight in_features must match x"

    # Adapt tile sizes to the problem while staying TPU-legal:
    #   tm multiple of 8 (f32 sublanes), tn/tk multiples of 128 (lanes).
    tm = min(tm, _round_up(M, 8))
    tn = min(tn, _round_up(N, 128))
    tk = min(tk, _round_up(K, 128))

    Mp, Np, Kp = _round_up(M, tm), _round_up(N, tn), _round_up(K, tk)

    xp = x if (Mp == M and Kp == K) else jnp.pad(x, ((0, Mp - M), (0, Kp - K)))
    wp = weight if (Np == N and Kp == K) else jnp.pad(
        weight, ((0, Np - N), (0, Kp - K)))
    bp = bias if Np == N else jnp.pad(bias, (0, Np - N))
    b2d = bp.reshape(1, Np)  # 2D for TPU lane layout

    n_k = Kp // tk
    cost = pl.CostEstimate(
        flops=2 * Mp * Np * Kp,
        transcendentals=0,
        bytes_accessed=4 * (Mp * Kp + Kp * Np + Mp * Np),
    )

    if n_k == 1:
        # Fast path: whole reduction fits in one K tile. No accumulator
        # scratch, no reduction axis -> both grid axes stay parallel.
        out = pl.pallas_call(
            _linear_kernel_single_k,
            out_shape=jax.ShapeDtypeStruct((Mp, Np), x.dtype),
            grid_spec=pltpu.PrefetchScalarGridSpec(
                num_scalar_prefetch=0,
                grid=(Mp // tm, Np // tn),
                in_specs=[
                    pl.BlockSpec((tm, Kp), lambda i, j: (i, 0)),   # x
                    pl.BlockSpec((tn, Kp), lambda i, j: (j, 0)),   # weight (N,K)
                    pl.BlockSpec((1, tn), lambda i, j: (0, j)),    # bias
                ],
                out_specs=pl.BlockSpec((tm, tn), lambda i, j: (i, j)),
            ),
            compiler_params=pltpu.CompilerParams(
                dimension_semantics=("parallel", "parallel"),
                vmem_limit_bytes=64 << 20,
            ),
            cost_estimate=cost,
        )(xp, wp, b2d)
    else:
        out = pl.pallas_call(
            _linear_kernel_multi_k,
            out_shape=jax.ShapeDtypeStruct((Mp, Np), x.dtype),
            grid_spec=pltpu.PrefetchScalarGridSpec(
                num_scalar_prefetch=0,
                grid=(Mp // tm, Np // tn, n_k),
                in_specs=[
                    pl.BlockSpec((tm, tk), lambda i, j, k: (i, k)),   # x
                    pl.BlockSpec((tn, tk), lambda i, j, k: (j, k)),   # weight (N,K)
                    pl.BlockSpec((1, tn), lambda i, j, k: (0, j)),    # bias
                ],
                out_specs=pl.BlockSpec((tm, tn), lambda i, j, k: (i, j)),
                scratch_shapes=[pltpu.VMEM((tm, tn), jnp.float32)],
            ),
            compiler_params=pltpu.CompilerParams(
                dimension_semantics=("parallel", "parallel", "arbitrary"),
                vmem_limit_bytes=64 << 20,
            ),
            cost_estimate=cost,
        )(xp, wp, b2d)

    return out[:M, :N]


def _reference(x, weight, bias):
    return jnp.dot(x, weight.T, precision=lax.Precision.HIGHEST) + bias


if __name__ == "__main__":
    key = jax.random.PRNGKey(0)

    # ---- Case 1: tiny shapes matching the original module example ----------
    k_x, k_w, k_b, key = jax.random.split(key, 4)
    batch, input_dim, output_dim = 8, 32, 16
    bound = 1.0 / jnp.sqrt(jnp.float32(input_dim))
    x_s = jax.random.normal(k_x, (batch, input_dim), dtype=jnp.float32)
    w_s = jax.random.uniform(k_w, (output_dim, input_dim),
                             minval=-bound, maxval=bound, dtype=jnp.float32)
    b_s = jax.random.uniform(k_b, (output_dim,),
                             minval=-bound, maxval=bound, dtype=jnp.float32)

    y_s = jax.block_until_ready(linear_forward(x_s, w_s, b_s))
    assert y_s.shape == (batch, output_dim)
    assert jnp.allclose(y_s, _reference(x_s, w_s, b_s), atol=1e-5, rtol=1e-5)

    # ---- Case 2: larger shapes exercising the tiled (M, N, K) grid ---------
    k_x, k_w, k_b, key = jax.random.split(key, 4)
    batch, input_dim, output_dim = 256, 512, 256
    bound = 1.0 / jnp.sqrt(jnp.float32(input_dim))
    x_l = jax.random.normal(k_x, (batch, input_dim), dtype=jnp.float32)
    w_l = jax.random.uniform(k_w, (output_dim, input_dim),
                             minval=-bound, maxval=bound, dtype=jnp.float32)
    b_l = jax.random.uniform(k_b, (output_dim,),
                             minval=-bound, maxval=bound, dtype=jnp.float32)

    # tm=tn=128, tk=256 -> grid (2, 2, 2): multi-step K reduction + parallel M/N.
    y_l = jax.block_until_ready(
        linear_forward(x_l, w_l, b_l, tm=128, tn=128, tk=256))
    assert y_l.shape == (batch, output_dim)
    assert jnp.allclose(y_l, _reference(x_l, w_l, b_l), atol=1e-4, rtol=1e-4)

    # TODO(synk): for bf16 MXU peak on v6e/v7x, cast x/weight to bf16 at the
    # call boundary (keep f32 accumulation) and loosen test tolerances.
    print("KERNEL_OK")
</pallas_src>

<mosaic_0001>
module attributes {stable_mosaic.version = 11 : i64} {
  func.func @_linear_kernel_single_k(%arg0: i32, %arg1: i32, %arg2: memref<8x128xf32, #tpu.memory_space<vmem>>, %arg3: memref<128x128xf32, #tpu.memory_space<vmem>>, %arg4: memref<1x128xf32, #tpu.memory_space<vmem>>, %arg5: memref<8x128xf32, #tpu.memory_space<vmem>>) attributes {dimension_semantics = [#tpu.dimension_semantics<parallel>, #tpu.dimension_semantics<parallel>], iteration_bounds = array<i64: 1, 1>, scalar_prefetch = 0 : i64, scratch_operands = 0 : i64, tpu.core_type = #tpu.core_type<tc>, window_params = [{transform_indices = @transform_0, window_bounds = array<i64: 8, 128>}, {transform_indices = @transform_1, window_bounds = array<i64: 128, 128>}, {transform_indices = @transform_2, window_bounds = array<i64: 1, 128>}, {transform_indices = @transform_3, window_bounds = array<i64: 8, 128>}]} {
    %c0 = arith.constant 0 : index
    %c0_0 = arith.constant 0 : index
    %0 = vector.load %arg2[%c0, %c0_0] : memref<8x128xf32, #tpu.memory_space<vmem>>, vector<8x128xf32>
    %c0_1 = arith.constant 0 : index
    %c0_2 = arith.constant 0 : index
    %1 = vector.load %arg3[%c0_1, %c0_2] : memref<128x128xf32, #tpu.memory_space<vmem>>, vector<128x128xf32>
    %cst = arith.constant dense<0.000000e+00> : vector<8x128xf32>
    %2 = tpu.matmul %0, %1, %cst {dimension_numbers = #tpu.dot_dimension_numbers<[1], [1], [0], [0], [0, 0, 1, 0], [], []>} : vector<8x128xf32>, vector<128x128xf32>, vector<8x128xf32> -> vector<8x128xf32>
    %c0_3 = arith.constant 0 : index
    %c0_4 = arith.constant 0 : index
    %3 = vector.load %arg4[%c0_3, %c0_4] : memref<1x128xf32, #tpu.memory_space<vmem>>, vector<1x128xf32>
    %4 = vector.broadcast %3 : vector<1x128xf32> to vector<8x128xf32>
    %5 = arith.addf %2, %4 : vector<8x128xf32>
    %c0_5 = arith.constant 0 : index
    %c0_6 = arith.constant 0 : index
    %6 = vector.load %arg5[%c0_5, %c0_6] : memref<8x128xf32, #tpu.memory_space<vmem>>, vector<8x128xf32>
    tpu.vector_store %arg5[%c0_5, %c0_6], %5 {strides = array<i32>} : memref<8x128xf32, #tpu.memory_space<vmem>>, vector<8x128xf32>,
    return
  }
  func.func @transform_0(%arg0: i32, %arg1: i32) -> (i32, i32) {
    %c0_i32 = arith.constant 0 : i32
    %c0_i32_0 = arith.constant 0 : i32
    return %arg0, %c0_i32 : i32, i32
  }
  func.func @transform_1(%arg0: i32, %arg1: i32) -> (i32, i32) {
    %c0_i32 = arith.constant 0 : i32
    %c0_i32_0 = arith.constant 0 : i32
    return %arg1, %c0_i32 : i32, i32
  }
  func.func @transform_2(%arg0: i32, %arg1: i32) -> (i32, i32) {
    %c0_i32 = arith.constant 0 : i32
    %c0_i32_0 = arith.constant 0 : i32
    return %c0_i32, %arg1 : i32, i32
  }
  func.func @transform_3(%arg0: i32, %arg1: i32) -> (i32, i32) {
    %c0_i32 = arith.constant 0 : i32
    return %arg0, %arg1 : i32, i32
  }
}

</mosaic_0001>

<bundles_post_ra>
// kernel: linear_forward.1
= control target key start
LH: loop header
LB: loop body
LE: loop exit
PB: predicated region body
PF: predicated region fallthrough
CT: control target
= control target key end

     0   :  { %s179_s0 = inlined_call_operand.vmem [shape: f32[8,128], index: 0, kind: input, shape index: {}]   ;;  %s180_s1 = inlined_call_operand.vmem [shape: f32[128,128], index: 1, kind: input, shape index: {}]   ;;  %s181_s2 = inlined_call_operand.vmem [shape: f32[1,128], index: 2, kind: input, shape index: {}]   ;;  %s182_s3 = inlined_call_operand.hbm [shape: f32[8,128], index: 3, kind: output, shape index: {}]  }
   0x1   :  { %v31_v0 = vld [vmem:[%s180_s1 + $0x78] sm:$0xff]  ;;  %v30_v1 = vld [vmem:[%s180_s1 + $0x70] sm:$0xff] }
   0x2   :  { %36 = vmatpush.xpose.msra.mxu0 %v31_v0 }
   0x3   :  { %8 = vsyncpa [#allocation3], 0  ;;  %v29_v2 = vld [vmem:[%s180_s1 + $0x68] sm:$0xff]  ;;  %v28_v3 = vld [vmem:[%s180_s1 + $0x60] sm:$0xff]  ;;  %s101_s21 = smov [#allocation2]   ;;  %s64_s25 = sshll.u32 %s182_s3, 4  ;;  %s65_s25 = int_to_ptr.hbm [resolvable:$true] %s64_s25 }
   0x4   :  { %v27_v4 = vld [vmem:[%s180_s1 + $0x58] sm:$0xff]  ;;  %v26_v5 = vld [vmem:[%s180_s1 + $0x50] sm:$0xff]  ;;  %v25_v6 = vld [vmem:[%s180_s1 + $0x48] sm:$0xff]  ;;  %s62_s22 = sshll.u32 %s101_s21, 4  ;;  %s63_s22 = int_to_ptr.vmem [resolvable:$true] %s62_s22 }
   0x5   :  { %v24_v7 = vld [vmem:[%s180_s1 + $0x40] sm:$0xff]  ;;  %v23_v8 = vld [vmem:[%s180_s1 + $0x38] sm:$0xff]  ;;  %v22_v9 = vld [vmem:[%s180_s1 + $0x30] sm:$0xff] }
   0x6   :  { %37 = vmatpush.xpose.msra.mxu0 %v30_v1  ;;  %v21_v10 = vld [vmem:[%s180_s1 + $0x28] sm:$0xff]  ;;  %v20_v11 = vld [vmem:[%s180_s1 + $0x20] sm:$0xff]  ;;  %v19_v12 = vld [vmem:[%s180_s1 + $0x18] sm:$0xff] }
   0x7   :  { %v18_v13 = vld [vmem:[%s180_s1 + $0x10] sm:$0xff]  ;;  %v17_v14 = vld [vmem:[%s180_s1 + $0x8] sm:$0xff]  ;;  %v16_v15 = vld [vmem:[%s180_s1] sm:$0xff] }
   0x8   :  { %v15_v16 = vld [vmem:[%s179_s0] sm:$0xff] }
   0x9   :  { %v74_v17 = vld [vmem:[%s181_s2] ss:$0 sm:$0xff] }
   0xa   :  { %38 = vmatpush.xpose.msra.mxu0 %v29_v2 }
   0xe   :  { %39 = vmatpush.xpose.msra.mxu0 %v28_v3 }
  0x12   :  { %40 = vmatpush.xpose.msra.mxu0 %v27_v4 }
  0x16   :  { %41 = vmatpush.xpose.msra.mxu0 %v26_v5 }
  0x1a   :  { %42 = vmatpush.xpose.msra.mxu0 %v25_v6 }
  0x1e   :  { %43 = vmatpush.xpose.msra.mxu0 %v24_v7 }
  0x22   :  { %44 = vmatpush.xpose.msra.mxu0 %v23_v8 }
  0x26   :  { %45 = vmatpush.xpose.msra.mxu0 %v22_v9 }
  0x2a   :  { %46 = vmatpush.xpose.msra.mxu0 %v21_v10 }
  0x2e   :  { %47 = vmatpush.xpose.msra.mxu0 %v20_v11 }
  0x32   :  { %48 = vmatpush.xpose.msra.mxu0 %v19_v12 }
  0x36   :  { %49 = vmatpush.xpose.msra.mxu0 %v18_v13 }
  0x3a   :  { %50 = vmatpush.xpose.msra.mxu0 %v17_v14 }
  0x3e   :  { %51 = vmatpush.xpose.msra.mxu0 %v16_v15 }
  0x41   :  { %52 = vmatmul.f32.vlgmr.msra.gmra.mxu0 %v15_v16 }
  0xbe   :  { %v53_v18 = vpop.f32.mrf.mxu0 }
  0xbf   :  { %v54_v19 = vadd.f32 %v74_v17, %v53_v18 }
  0xc1   :  { %56 = vst [vmem:[#allocation2] sm:$0xff] %v54_v19 }
  0xc2   :  { %67 = dma.vmem_to_hbm [thread:$0]  %s63_s22, 128, %s65_s25, [#allocation3]  }
  0xc3   :  { %99 = dma.done.wait [#allocation3], 128  }
  0xc4   :  { %100 = vsyncadd [#allocation3], 4294967168 }
  0xc5   :  { %72 = vsyncpa [#allocation3], 1 }

</bundles_post_ra>
